<compile_context>
chip_gen: v6e
topology: v6e:2x2x1
jax: 0.10.0
libtpu: 0.0.40
codegen_flags: <defaults>
</compile_context>

<pallas_src>
import functools

import jax
import jax.numpy as jnp
from jax import lax
from jax.experimental import pallas as pl
from jax.experimental.pallas import tpu as pltpu

H = W = 28          # fixed by nn.LayerNorm((out_channels, 28, 28))
HW = H * W
KSIZE = 3
EPS = 1e-5          # PyTorch LayerNorm default


def _conv_ln_kernel(p_ref, w_ref, b_ref, g_ref, beta_ref, o_ref):
    """One batch element per grid step (transposed, lane-dense layout).

    p_ref    : (1, K9, HW)   im2col patches, pixels on the lane axis
    w_ref    : (C_out, K9)   conv weight, OIHW flattened (free reshape)
    b_ref    : (C_out, 1)    conv bias
    g_ref    : (C_out, HW)   LayerNorm gamma (free reshape of (C_out,28,28))
    beta_ref : (C_out, HW)   LayerNorm beta
    o_ref    : (1, C_out, HW)
    """
    patches = p_ref[0]                                      # (K9, HW)
    # Convolution as one MXU matmul: (C_out, K9) x (K9, HW) -> (C_out, HW).
    y = jnp.dot(w_ref[...], patches,
                preferred_element_type=jnp.float32)         # (C_out, HW)
    y = y + b_ref[...]                                      # (C_out, 1) bcast

    # LayerNorm over the whole (C_out, H, W) slab of this batch element.
    # Single pass: lane-axis partial sums first, then tiny cross-sublane finish.
    inv_n = 1.0 / float(y.shape[0] * y.shape[1])
    s1 = jnp.sum(y, axis=1, keepdims=True)                  # (C_out, 1)
    s2 = jnp.sum(y * y, axis=1, keepdims=True)              # (C_out, 1)
    mean = jnp.sum(s1) * inv_n
    var = jnp.sum(s2) * inv_n - mean * mean
    inv = lax.rsqrt(var + EPS)
    out = (y - mean) * inv * g_ref[...] + beta_ref[...]
    o_ref[0] = out.astype(o_ref.dtype)


def _im2col_t(x):
    """x: (N, C_in, H, W) -> patches (N, C_in*9, H*W).

    Row ordering is ci*9 + kh*3 + kw, matching OIHW weight flattening.
    Pixels end up on the last (lane) axis -- no large transpose needed.
    """
    N, C, Hh, Ww = x.shape
    xp = jnp.pad(x, ((0, 0), (0, 0), (1, 1), (1, 1)))
    cols = [xp[:, :, kh:kh + Hh, kw:kw + Ww]
            for kh in range(KSIZE) for kw in range(KSIZE)]      # 9 x (N,C,H,W)
    patches = jnp.stack(cols, axis=2)                           # (N, C, 9, H, W)
    return patches.reshape(N, C * KSIZE * KSIZE, Hh * Ww)       # (N, C*9, HW)


@functools.partial(jax.jit, static_argnames=())
def conv2d_with_layernorm(x, conv_w, conv_b, ln_w, ln_b):
    """x: (N, C_in, 28, 28) NCHW.  Returns (N, C_out, 28, 28) NCHW."""
    N, C_in, Hh, Ww = x.shape
    assert (Hh, Ww) == (H, W)
    C_out = conv_w.shape[0]
    K9 = C_in * KSIZE * KSIZE

    patches = _im2col_t(x).astype(jnp.float32)                  # (N, K9, HW)
    w_mat = conv_w.reshape(C_out, K9).astype(jnp.float32)       # (C_out, K9)
    b_mat = conv_b.reshape(C_out, 1).astype(jnp.float32)        # (C_out, 1)
    gamma = ln_w.reshape(C_out, HW).astype(jnp.float32)         # (C_out, HW)
    beta = ln_b.reshape(C_out, HW).astype(jnp.float32)          # (C_out, HW)

    flops = 2 * N * C_out * K9 * HW + 8 * N * C_out * HW
    bytes_accessed = 4 * (patches.size + w_mat.size + b_mat.size
                          + gamma.size + beta.size + N * C_out * HW)
    cost = pl.CostEstimate(flops=flops, transcendentals=N,
                           bytes_accessed=bytes_accessed)

    out_chw = pl.pallas_call(
        _conv_ln_kernel,
        out_shape=jax.ShapeDtypeStruct((N, C_out, HW), jnp.float32),
        grid_spec=pltpu.PrefetchScalarGridSpec(
            num_scalar_prefetch=0,
            grid=(N,),
            in_specs=[
                pl.BlockSpec((1, K9, HW), lambda n: (n, 0, 0)),
                pl.BlockSpec((C_out, K9), lambda n: (0, 0)),
                pl.BlockSpec((C_out, 1), lambda n: (0, 0)),
                pl.BlockSpec((C_out, HW), lambda n: (0, 0)),
                pl.BlockSpec((C_out, HW), lambda n: (0, 0)),
            ],
            out_specs=pl.BlockSpec((1, C_out, HW), lambda n: (n, 0, 0)),
        ),
        compiler_params=pltpu.CompilerParams(
            dimension_semantics=("parallel",)),
        cost_estimate=cost,
    )(patches, w_mat, b_mat, gamma, beta)                       # (N, C_out, HW)

    # Channel-major already: pure (free) reshape back to NCHW.
    return out_chw.reshape(N, C_out, H, W)


def _reference(x, conv_w, conv_b, ln_w, ln_b):
    y = lax.conv_general_dilated(
        x.astype(jnp.float32), conv_w.astype(jnp.float32),
        window_strides=(1, 1), padding="SAME",
        dimension_numbers=("NCHW", "OIHW", "NCHW"))
    y = y + conv_b[None, :, None, None]
    mean = jnp.mean(y, axis=(1, 2, 3), keepdims=True)
    var = jnp.mean((y - mean) ** 2, axis=(1, 2, 3), keepdims=True)
    yn = (y - mean) * lax.rsqrt(var + EPS)
    return yn * ln_w[None] + ln_b[None]


if __name__ == "__main__":
    key = jax.random.PRNGKey(0)
    N, C_in, C_out = 2, 4, 8

    k1, k2, k3, k4 = jax.random.split(key, 4)
    x = jax.random.normal(k1, (N, C_in, H, W), dtype=jnp.float32)

    # Deterministic synthetic parameters (shapes follow the module __init__).
    fan_in = C_in * KSIZE * KSIZE
    bound = 1.0 / (fan_in ** 0.5)
    conv_w = jax.random.uniform(k2, (C_out, C_in, KSIZE, KSIZE),
                                minval=-bound, maxval=bound, dtype=jnp.float32)
    conv_b = jax.random.uniform(k3, (C_out,),
                                minval=-bound, maxval=bound, dtype=jnp.float32)
    # nn.LayerNorm defaults: weight=1, bias=0; perturb slightly (deterministic)
    # so the affine path is actually exercised.
    ln_w = jnp.ones((C_out, H, W), jnp.float32) + \
        0.01 * jax.random.normal(k4, (C_out, H, W), dtype=jnp.float32)
    ln_b = 0.01 * jnp.arange(C_out * H * W, dtype=jnp.float32).reshape(
        C_out, H, W) / (C_out * H * W)

    out = conv2d_with_layernorm(x, conv_w, conv_b, ln_w, ln_b)
    out = jax.block_until_ready(out)

    ref = _reference(x, conv_w, conv_b, ln_w, ln_b)
    assert out.shape == (N, C_out, H, W)
    assert jnp.allclose(out, ref, atol=1e-4, rtol=1e-4), \
        float(jnp.max(jnp.abs(out - ref)))

    print("KERNEL_OK")
</pallas_src>

<mosaic_0001>
module attributes {stable_mosaic.version = 11 : i64} {
  func.func @_conv_ln_kernel(%arg0: i32, %arg1: memref<1x36x784xf32, #tpu.memory_space<vmem>>, %arg2: memref<8x36xf32, #tpu.memory_space<vmem>>, %arg3: memref<8x1xf32, #tpu.memory_space<vmem>>, %arg4: memref<8x784xf32, #tpu.memory_space<vmem>>, %arg5: memref<8x784xf32, #tpu.memory_space<vmem>>, %arg6: memref<1x8x784xf32, #tpu.memory_space<vmem>>) attributes {dimension_semantics = [#tpu.dimension_semantics<parallel>], iteration_bounds = array<i64: 2>, scalar_prefetch = 0 : i64, scratch_operands = 0 : i64, tpu.core_type = #tpu.core_type<tc>, window_params = [{transform_indices = @transform_0, window_bounds = array<i64: 1, 36, 784>}, {pipeline_mode = #tpu.pipeline_mode<synchronous>, transform_indices = @transform_1, window_bounds = array<i64: 8, 36>}, {pipeline_mode = #tpu.pipeline_mode<synchronous>, transform_indices = @transform_2, window_bounds = array<i64: 8, 1>}, {pipeline_mode = #tpu.pipeline_mode<synchronous>, transform_indices = @transform_3, window_bounds = array<i64: 8, 784>}, {pipeline_mode = #tpu.pipeline_mode<synchronous>, transform_indices = @transform_4, window_bounds = array<i64: 8, 784>}, {transform_indices = @transform_5, window_bounds = array<i64: 1, 8, 784>}]} {
    %c0 = arith.constant 0 : index
    %c0_0 = arith.constant 0 : index
    %c0_1 = arith.constant 0 : index
    %0 = vector.load %arg1[%c0, %c0_0, %c0_1] : memref<1x36x784xf32, #tpu.memory_space<vmem>>, vector<1x36x784xf32>
    %1 = vector.shape_cast %0 : vector<1x36x784xf32> to vector<36x784xf32>
    %c0_2 = arith.constant 0 : index
    %c0_3 = arith.constant 0 : index
    %2 = vector.load %arg2[%c0_2, %c0_3] : memref<8x36xf32, #tpu.memory_space<vmem>>, vector<8x36xf32>
    %cst = arith.constant dense<0.000000e+00> : vector<8x784xf32>
    %3 = tpu.matmul %2, %1, %cst {dimension_numbers = #tpu.dot_dimension_numbers<[1], [0], [0], [1], [0, 0, 1, 1], [], []>} : vector<8x36xf32>, vector<36x784xf32>, vector<8x784xf32> -> vector<8x784xf32>
    %c0_4 = arith.constant 0 : index
    %c0_5 = arith.constant 0 : index
    %4 = vector.load %arg3[%c0_4, %c0_5] : memref<8x1xf32, #tpu.memory_space<vmem>>, vector<8x1xf32>
    %5 = vector.broadcast %4 : vector<8x1xf32> to vector<8x784xf32>
    %6 = arith.addf %3, %5 : vector<8x784xf32>
    %cst_6 = arith.constant dense<0.000000e+00> : vector<8xf32>
    %7 = vector.multi_reduction <add>, %6, %cst_6 [1] : vector<8x784xf32> to vector<8xf32>
    %8 = vector.shape_cast %7 : vector<8xf32> to vector<8x1xf32>
    %9 = arith.mulf %6, %6 : vector<8x784xf32>
    %cst_7 = arith.constant dense<0.000000e+00> : vector<8xf32>
    %10 = vector.multi_reduction <add>, %9, %cst_7 [1] : vector<8x784xf32> to vector<8xf32>
    %11 = vector.shape_cast %10 : vector<8xf32> to vector<8x1xf32>
    %12 = vector.shape_cast %8 : vector<8x1xf32> to vector<1x8x1xf32>
    %cst_8 = arith.constant dense<0.000000e+00> : vector<1xf32>
    %13 = vector.multi_reduction <add>, %12, %cst_8 [1, 2] : vector<1x8x1xf32> to vector<1xf32>
    %14 = vector.shape_cast %13 : vector<1xf32> to vector<1x1x1xf32>
    %15 = vector.extract %14[0, 0, 0] : f32 from vector<1x1x1xf32>
    %cst_9 = arith.constant 1.59438772E-4 : f32
    %16 = arith.mulf %15, %cst_9 : f32
    %17 = vector.shape_cast %11 : vector<8x1xf32> to vector<1x8x1xf32>
    %cst_10 = arith.constant dense<0.000000e+00> : vector<1xf32>
    %18 = vector.multi_reduction <add>, %17, %cst_10 [1, 2] : vector<1x8x1xf32> to vector<1xf32>
    %19 = vector.shape_cast %18 : vector<1xf32> to vector<1x1x1xf32>
    %20 = vector.extract %19[0, 0, 0] : f32 from vector<1x1x1xf32>
    %cst_11 = arith.constant 1.59438772E-4 : f32
    %21 = arith.mulf %20, %cst_11 : f32
    %22 = arith.mulf %16, %16 : f32
    %23 = arith.subf %21, %22 : f32
    %cst_12 = arith.constant 9.99999974E-6 : f32
    %24 = arith.addf %23, %cst_12 : f32
    %25 = math.rsqrt %24 : f32
    %26 = vector.broadcast %16 : f32 to vector<8x784xf32>
    %27 = arith.subf %6, %26 : vector<8x784xf32>
    %28 = vector.broadcast %25 : f32 to vector<8x784xf32>
    %29 = arith.mulf %27, %28 : vector<8x784xf32>
    %c0_13 = arith.constant 0 : index
    %c0_14 = arith.constant 0 : index
    %30 = vector.load %arg4[%c0_13, %c0_14] : memref<8x784xf32, #tpu.memory_space<vmem>>, vector<8x784xf32>
    %31 = arith.mulf %29, %30 : vector<8x784xf32>
    %c0_15 = arith.constant 0 : index
    %c0_16 = arith.constant 0 : index
    %32 = vector.load %arg5[%c0_15, %c0_16] : memref<8x784xf32, #tpu.memory_space<vmem>>, vector<8x784xf32>
    %33 = arith.addf %31, %32 : vector<8x784xf32>
    %c0_17 = arith.constant 0 : index
    %c0_18 = arith.constant 0 : index
    %c0_19 = arith.constant 0 : index
    %34 = vector.load %arg6[%c0_17, %c0_18, %c0_19] : memref<1x8x784xf32, #tpu.memory_space<vmem>>, vector<1x8x784xf32>
    %35 = vector.shape_cast %34 : vector<1x8x784xf32> to vector<8x784xf32>
    %36 = vector.shape_cast %33 : vector<8x784xf32> to vector<1x8x784xf32>
    tpu.vector_store %arg6[%c0_17, %c0_18, %c0_19], %36 {strides = array<i32>} : memref<1x8x784xf32, #tpu.memory_space<vmem>>, vector<1x8x784xf32>,
    return
  }
  func.func @transform_0(%arg0: i32) -> (i32, i32, i32) {
    %c0_i32 = arith.constant 0 : i32
    %c0_i32_0 = arith.constant 0 : i32
    %c0_i32_1 = arith.constant 0 : i32
    return %arg0, %c0_i32, %c0_i32_0 : i32, i32, i32
  }
  func.func @transform_1(%arg0: i32) -> (i32, i32) {
    %c0_i32 = arith.constant 0 : i32
    %c0_i32_0 = arith.constant 0 : i32
    %c0_i32_1 = arith.constant 0 : i32
    return %c0_i32, %c0_i32_0 : i32, i32
  }
  func.func @transform_2(%arg0: i32) -> (i32, i32) {
    %c0_i32 = arith.constant 0 : i32
    %c0_i32_0 = arith.constant 0 : i32
    %c0_i32_1 = arith.constant 0 : i32
    return %c0_i32, %c0_i32_0 : i32, i32
  }
  func.func @transform_3(%arg0: i32) -> (i32, i32) {
    %c0_i32 = arith.constant 0 : i32
    %c0_i32_0 = arith.constant 0 : i32
    %c0_i32_1 = arith.constant 0 : i32
    return %c0_i32, %c0_i32_0 : i32, i32
  }
  func.func @transform_4(%arg0: i32) -> (i32, i32) {
    %c0_i32 = arith.constant 0 : i32
    %c0_i32_0 = arith.constant 0 : i32
    %c0_i32_1 = arith.constant 0 : i32
    return %c0_i32, %c0_i32_0 : i32, i32
  }
  func.func @transform_5(%arg0: i32) -> (i32, i32, i32) {
    %c0_i32 = arith.constant 0 : i32
    %c0_i32_0 = arith.constant 0 : i32
    %c0_i32_1 = arith.constant 0 : i32
    return %arg0, %c0_i32, %c0_i32_0 : i32, i32, i32
  }
}

</mosaic_0001>

<bundles_post_ra>
// kernel: conv2d_with_layernorm.1
= control target key start
LH: loop header
LB: loop body
LE: loop exit
PB: predicated region body
PF: predicated region fallthrough
CT: control target
= control target key end

     0   :  { %s839_s18 = smov 0   ;;  %s1010_s0 = inlined_call_operand.vmem [shape: f32[2,36,784], index: 0, kind: input, shape index: {}]   ;;  %s1011_s1 = inlined_call_operand.vmem [shape: f32[8,36], index: 1, kind: input, shape index: {}]   ;;  %s1012_s2 = inlined_call_operand.vmem [shape: f32[8,1], index: 2, kind: input, shape index: {}]   ;;  %s1013_s3 = inlined_call_operand.vmem [shape: f32[8,784], index: 3, kind: input, shape index: {}]   ;;  %s1014_s4 = inlined_call_operand.vmem [shape: f32[8,784], index: 4, kind: input, shape index: {}]   ;;  %s1015_s5 = inlined_call_operand.vmem [shape: f32[2,8,784], index: 5, kind: output, shape index: {}]  }
   0x1 LB: > { %s737_s19 = sadd.s32 4294967295, %s804_s18   ;;  %p741_p0 = scmp.ge.s32.totalorder %s804_s18, 1  ;;  %s804_s18 = sphi %s839_s18, %s15_s18  }
   0x2   : > { %p187_p1 = scmp.lt.s32.totalorder %s804_s18, 3 }
   0x4   : > { %p188_p2 = pnand %p741_p0, %p187_p1 }
   0x5   : > { %p215_p3 = scmp.lt.s32.totalorder (!%p188_p2), %s737_s19, 1 }
   0x6   : > { %191 = sbr.rel (%p188_p2) target bundleno = 664 (0x298), region = 40 }
   0xb   : > { %v806_v0 = vmov 0.0   ;;  %v261_v1 = vld [vmem:[%s1012_s2] sm:$0xff]  ;;  %s1017_s19 = smov (!%p215_p3, %s737_s19), 1  ;;  %v807_v2 = vmov 0   ;;  %vm271_vm0 = vcmask 1043456   ;;  %vm267_vm1 = vcmask 293888  }
   0xc   : > { %357 = vmatprep.mubr.f32.mxu0 %v806_v0  ;;  %428 = vmatprep.mubr.f32.mxu1 %v806_v0  ;;  %s776_s22 = smul.u32 280, %s1017_s19  ;;  %v260_v23 = vld [vmem:[%s1011_s1] sm:$0xff]  ;;  %vm808_vm2 = vmmov 0   ;;  %vm581_vm3 = vcmask 130048   ;;  %vm602_vm4 = vcmask 7168  }
   0xd   : > { %795 = vset.pattern.permute.xlu0 %v807_v2  ;;  %s777_s15 = smul.u32 56, %s1017_s19 }
   0xe   : > { %264 = vperm.xlu0 %795, %v261_v1   ;;  %s858_s25 = scalar_lea.vmem %s1010_s0, %s776_s22 }
   0xf   : > { %v254_v3 = vld [vmem:[%s858_s25 + $0xe8] sm:$0xf]  ;;  %v256_v4 = vld [vmem:[%s858_s25 + $0xf8] sm:$0xf]  ;;  %v253_v5 = vld [vmem:[%s858_s25 + $0xe0] sm:$0xf]  ;;  %s224_s21 = scalar_lea.vmem %s1015_s5, %s777_s15 }
  0x10   : > { %744 = vmatprep.subr.msk.mxu0 %vm271_vm0, %v254_v3  ;;  %747 = vmatprep.subr.msk.mxu1 %vm271_vm0, %v256_v4  ;;  %v255_v6 = vld [vmem:[%s858_s25 + $0xf0] sm:$0xf]  ;;  %v249_v8 = vld [vmem:[%s858_s25 + $0xc0] sm:$0xff]  ;;  %v246_v9 = vld [vmem:[%s858_s25 + $0xa8] sm:$0xff] }
  0x11   : > { %v247_v7 = vld [vmem:[%s858_s25 + $0xb0] sm:$0xff]  ;;  %745 = vmatpush1.msk.msra.mxu0 %vm271_vm0, %v253_v5  ;;  %748 = vmatpush1.msk.msra.mxu1 %vm271_vm0, %v255_v6  ;;  %v248_v10 = vld [vmem:[%s858_s25 + $0xb8] sm:$0xff]  ;;  %v242_v12 = vld [vmem:[%s858_s25 + $0x88] sm:$0xff] }
  0x12   : > { %v240_v11 = vld [vmem:[%s858_s25 + $0x78] sm:$0xff]  ;;  %317 = vmatprep.subr.mxu0 %v247_v7  ;;  %388 = vmatprep.subr.mxu1 %v249_v8  ;;  %v239_v13 = vld [vmem:[%s858_s25 + $0x70] sm:$0xff]  ;;  %v241_v14 = vld [vmem:[%s858_s25 + $0x80] sm:$0xff] }
  0x13   : > { %318 = vmatpush1.msra.mxu0 %v246_v9  ;;  %389 = vmatpush1.msra.mxu1 %v248_v10  ;;  %v233_v15 = vld [vmem:[%s858_s25 + $0x40] sm:$0xff]  ;;  %v235_v16 = vld [vmem:[%s858_s25 + $0x50] sm:$0xff]  ;;  %v232_v17 = vld [vmem:[%s858_s25 + $0x38] sm:$0xff] }
  0x14   : > { %319 = vmatprep.subr.mxu0 %v240_v11  ;;  %390 = vmatprep.subr.mxu1 %v242_v12  ;;  %v234_v18 = vld [vmem:[%s858_s25 + $0x48] sm:$0xff]  ;;  %v228_v20 = vld [vmem:[%s858_s25 + $0x18] sm:$0xff]  ;;  %v225_v21 = vld [vmem:[%s858_s25] sm:$0xff] }
  0x15   : > { %320 = vmatpush1.msra.mxu0 %v239_v13  ;;  %391 = vmatpush1.msra.mxu1 %v241_v14  ;;  %v226_v19 = vld [vmem:[%s858_s25 + $0x8] sm:$0xff]  ;;  %v227_v22 = vld [vmem:[%s858_s25 + $0x10] sm:$0xff]  ;;  %v257_v25 = vld [vmem:[%s858_s25 + $0x100] sm:$0xf] }
  0x16   : > { %321 = vmatprep.subr.mxu0 %v233_v15  ;;  %392 = vmatprep.subr.mxu1 %v235_v16  ;;  %v258_v24 = vld [vmem:[%s858_s25 + $0x108] sm:$0xf]  ;;  %v259_v26 = vld [vmem:[%s858_s25 + $0x110] sm:$0xf]  ;;  %v252_v29 = vld [vmem:[%s858_s25 + $0xd8] sm:$0xff] }
  0x17   : > { %322 = vmatpush1.msra.mxu0 %v232_v17  ;;  %393 = vmatpush1.msra.mxu1 %v234_v18  ;;  %v251_v27 = vld [vmem:[%s858_s25 + $0xd0] sm:$0xff]  ;;  %v250_v28 = vld [vmem:[%s858_s25 + $0xc8] sm:$0xff]  ;;  %v244_v30 = vld [vmem:[%s858_s25 + $0x98] sm:$0xff] }
  0x18   : > { %323 = vmatprep.subr.mxu0 %v226_v19  ;;  %394 = vmatprep.subr.mxu1 %v228_v20  ;;  %v243_v31 = vld [vmem:[%s858_s25 + $0x90] sm:$0xff]  ;;  %v245_v32 = vld [vmem:[%s858_s25 + $0xa0] sm:$0xff]  ;;  %v236_v34 = vld [vmem:[%s858_s25 + $0x58] sm:$0xff] }
  0x19   : > { %324 = vmatpush1.msra.mxu0 %v225_v21  ;;  %395 = vmatpush1.msra.mxu1 %v227_v22  ;;  %v237_v33 = vld [vmem:[%s858_s25 + $0x60] sm:$0xff]  ;;  %v238_v35 = vld [vmem:[%s858_s25 + $0x68] sm:$0xff]  ;;  %v231_v38 = vld [vmem:[%s858_s25 + $0x30] sm:$0xff] }
  0x1a   : > { %746 = vmatmul.mubr.msk.f32.vlgmr.msra.gmra.mxu0 %vm267_vm1, %v260_v23  ;;  %750 = vmatprep.subr.msk.mxu0 %vm271_vm0, %v258_v24  ;;  %v230_v36 = vld [vmem:[%s858_s25 + $0x28] sm:$0xff]  ;;  %v229_v37 = vld [vmem:[%s858_s25 + $0x20] sm:$0xff] }
  0x1b   : > { %763 = vmatprep.subr.mxu1 %v806_v0  ;;  %749 = vmatmul.mubr.msk.f32.vlgmr.msra.gmra.mxu1 %vm267_vm1, %v260_v23 }
  0x1c   : > { %751 = vmatpush1.msk.msra.mxu0 %vm271_vm0, %v257_v25  ;;  %764 = vmatpush3.msk.msra.mxu1 %vm271_vm0, %v259_v26 }
  0x1d   : > { %459 = vmatprep.subr.mxu0 %v251_v27  ;;  %765 = vmatprep.subr.mxu1 %v806_v0 }
  0x1e   : > { %460 = vmatpush1.msra.mxu0 %v250_v28  ;;  %766 = vmatpush3.msra.mxu1 %v252_v29 }
  0x1f   : > { %461 = vmatprep.subr.mxu0 %v244_v30  ;;  %767 = vmatprep.subr.mxu1 %v806_v0 }
  0x20   : > { %462 = vmatpush1.msra.mxu0 %v243_v31  ;;  %768 = vmatpush3.msra.mxu1 %v245_v32 }
  0x21   : > { %463 = vmatprep.subr.mxu0 %v237_v33  ;;  %769 = vmatprep.subr.mxu1 %v806_v0 }
  0x22   : > { %464 = vmatpush1.msra.mxu0 %v236_v34  ;;  %770 = vmatpush3.msra.mxu1 %v238_v35 }
  0x23   : > { %465 = vmatprep.subr.mxu0 %v230_v36  ;;  %771 = vmatprep.subr.mxu1 %v806_v0 }
  0x24   : > { %466 = vmatpush1.msra.mxu0 %v229_v37  ;;  %499 = vmatprep.mubr.f32.mxu0 %v806_v0  ;;  %v647_v37 = vld [vmem:[%s1013_s3] sm:$0xff] }
  0x25   : > { %772 = vmatpush3.msra.mxu1 %v231_v38  ;;  %773 = vmatprep.mubr.msk.f32.mxu1 %vm808_vm2, %v806_v0  ;;  %v648_v38 = vld [vmem:[%s1013_s3 + $0x8] sm:$0xff] }
  0x26   : > { %752 = vmatmul.mubr.msk.f32.vlgmr.msra.gmra.mxu0 %vm267_vm1, %v260_v23  ;;  %774 = vmatmul.mubr.msk.f32.vlgmr.msra.gmra.mxu1 %vm267_vm1, %v260_v23 }
  0x89   : > { %v265_v39 = vpop.permute.xlu0 %264 }
  0xda   : > { %v359_v40 = vpop.f32.mrf.mxu0 }
  0xdb   : > { %v916_v41 = vadd.f32 %v359_v40, %v265_v39  ;;  %v430_v43 = vpop.f32.mrf.mxu1 }
  0xdc   : > { %v361_v42 = vpop.f32.mrf.mxu0  ;;  %v922_v46 = vadd.f32 %v430_v43, %v265_v39  ;;  %v649_v43 = vld [vmem:[%s1013_s3 + $0x10] sm:$0xff] }
  0xdd   : > { %v918_v44 = vadd.f32 %v361_v42, %v265_v39  ;;  %v586_v45 = vmul.f32 %v916_v41, %v916_v41  ;;  %v432_v49 = vpop.f32.mrf.mxu1 }
  0xde   : > { %v588_v51 = vmul.f32 %v922_v46, %v922_v46  ;;  %v931_v53 = vadd.f32 %v432_v49, %v265_v39 }
  0xdf   : > { %v576_v47 = vadd.f32 %v918_v44, %v916_v41  ;;  %v587_v48 = vmul.f32 %v918_v44, %v918_v44 }
  0xe0   : > { %v589_v58 = vmul.f32 %v931_v53, %v931_v53 }
  0xe1   : > { %v593_v50 = vadd.f32 %v587_v48, %v586_v45  ;;  %v577_v52 = vadd.f32 %v576_v47, %v922_v46  ;;  %v651_v45 = vld [vmem:[%s1013_s3 + $0x20] sm:$0xff] }
  0xe3   : > { %v594_v54 = vadd.f32 %v593_v50, %v588_v51  ;;  %v578_v57 = vadd.f32 %v577_v52, %v931_v53  ;;  %v652_v50 = vld [vmem:[%s1013_s3 + $0x28] sm:$0xff]  ;;  %v653_v51 = vld [vmem:[%s1013_s3 + $0x30] sm:$0xff]  ;;  %v661_v52 = vld [vmem:[%s1014_s4] sm:$0xff] }
  0xe5   : > { %v595_v2 = vadd.f32 %v594_v54, %v589_v58  ;;  %v664_v58 = vld [vmem:[%s1014_s4 + $0x18] sm:$0xff] }
  0xe6   : > { %v501_v55 = vpop.f32.mrf.mxu0  ;;  %v572_v56 = vpop.f32.mrf.mxu1 }
  0xe7   : > { %v936_v59 = vadd.f32 %v501_v55, %v265_v39  ;;  %v938_v60 = vadd.f32 %v572_v56, %v265_v39  ;;  %v662_v56 = vld [vmem:[%s1014_s4 + $0x8] sm:$0xff] }
  0xe8   : > { %v503_v61 = vpop.f32.mrf.mxu0  ;;  %v775_v62 = vpop.f32.mrf.mxu1 }
  0xe9   : > { %v579_v63 = vadd.f32 %v578_v57, %v936_v59  ;;  %v590_v0 = vmul.f32 %v936_v59, %v936_v59  ;;  %v943_v1 = vadd.f32 %v503_v61, %v265_v39  ;;  %v592_v3 = vmul.f32 %v938_v60, %v938_v60  ;;  %v663_v57 = vld [vmem:[%s1014_s4 + $0x10] sm:$0xff] }
  0xea   : > { %v582_v7 = vsel %vm581_vm3, %v938_v60, 0.0 }
  0xeb   : > { %v580_v4 = vadd.f32 %v579_v63, %v943_v1  ;;  %v591_v5 = vmul.f32 %v943_v1, %v943_v1  ;;  %v596_v6 = vadd.f32 %v595_v2, %v590_v0  ;;  %v598_v10 = vsel %vm581_vm3, %v592_v3, 0.0  ;;  %v665_v63 = vld [vmem:[%s1014_s4 + $0x20] sm:$0xff]  ;;  %v666_v0 = vld [vmem:[%s1014_s4 + $0x28] sm:$0xff] }
  0xed   : > { %v583_v8 = vadd.f32 %v582_v7, %v580_v4  ;;  %v597_v9 = vadd.f32 %v596_v6, %v591_v5 }
  0xef   : > { %584 = vadd.xlane.f32.xlu0 %v583_v8  ;;  %v599_v11 = vadd.f32 %v598_v10, %v597_v9 }
  0xf1   : > { %600 = vadd.xlane.f32.xlu1 %v599_v11 }
 0x178   : > { %v585_v12 = vpop.xlane.xlu0 %584 }
 0x179   : > { %v603_v13 = vsel %vm602_vm4, %v585_v12, 0.0 }
 0x17a   : > { %v601_v14 = vpop.xlane.xlu1 %600  ;;  %604 = vadd.xlane.f32.xlu1 %v603_v13 }
 0x17b   : > { %v614_v15 = vsel %vm602_vm4, %v601_v14, 0.0 }
 0x17e   : > { %615 = vadd.xlane.f32.xlu1 %v614_v15 }
 0x203   : > { %v605_v16 = vpop.xlane.xlu1 %604 }
 0x204   : > { %v606_v17 = vrot.slane %v605_v16, 4 }
 0x206   : > { %v607_v18 = vadd.f32 %v606_v17, %v605_v16 }
 0x207   : > { %v616_v19 = vpop.xlane.xlu1 %615 }
 0x208   : > { %v608_v20 = vrot.slane %v607_v18, 2  ;;  %v617_v21 = vrot.slane %v616_v19, 4 }
 0x20a   : > { %v618_v22 = vadd.f32 %v617_v21, %v616_v19  ;;  %v609_v23 = vadd.f32 %v608_v20, %v607_v18 }
 0x20c   : > { %v619_v24 = vrot.slane %v618_v22, 2  ;;  %v610_v25 = vrot.slane %v609_v23, 1 }
 0x20e   : > { %v620_v26 = vadd.f32 %v619_v24, %v618_v22  ;;  %v611_v27 = vadd.f32 %v610_v25, %v609_v23 }
 0x210   : > { %778 = vpush %v611_v27  ;;  %v621_v28 = vrot.slane %v620_v26, 1 }
 0x212   : > { %v622_v29 = vadd.f32 %v621_v28, %v620_v26 }
 0x214   : > { %780 = vpush %v622_v29 }
 0x241   : > { %s779_s28 = spop %778 }
 0x242   : > { %s613_s29 = smul.f32 0.00015943877, %s779_s28 }
 0x244   : > { %s625_s30 = smul.f32 %s613_s29, %s613_s29  ;;  %v631_v32 = vstv %s613_s29 }
 0x245   : > { %s781_s6 = spop %780  ;;  %v632_v33 = vsub.f32 %v916_v41, %v631_v32  ;;  %v633_v34 = vsub.f32 %v918_v44, %v631_v32  ;;  %v634_v35 = vsub.f32 %v922_v46, %v631_v32  ;;  %v635_v36 = vsub.f32 %v931_v53, %v631_v32  ;;  %v650_v44 = vld [vmem:[%s1013_s3 + $0x18] sm:$0xff] }
 0x246   : > { %s624_s7 = smul.f32 0.00015943877, %s781_s6  ;;  %v636_v39 = vsub.f32 %v936_v59, %v631_v32  ;;  %v637_v40 = vsub.f32 %v943_v1, %v631_v32  ;;  %v638_v41 = vsub.f32 %v938_v60, %v631_v32  ;;  %v667_v1 = vld [vmem:[%s1014_s4 + $0x30] sm:$0xff] }
 0x248   : > { %s626_s8 = ssub.f32 %s624_s7, %s625_s30 }
 0x24a   : > { %s627_s9 = sadd.f32 1e-05, %s626_s8 }
 0x24c   : > { %v628_v30 = vstv %s627_s9 }
 0x24d   : > { %796 = vrsqrt.f32 %v628_v30 }
 0x25a   : > { %v797_v31 = vpop.eup %796 }
 0x25b   : > { %782 = vpush %v797_v31 }
 0x28c   : > { %s783_s10 = spop %782 }
 0x28d   : > { %v639_v42 = vstv %s783_s10 }
 0x28e   : > { %v640_v46 = vmul.f32 %v639_v42, %v632_v33  ;;  %v641_v47 = vmul.f32 %v639_v42, %v633_v34  ;;  %v642_v48 = vmul.f32 %v639_v42, %v634_v35  ;;  %v643_v49 = vmul.f32 %v639_v42, %v635_v36 }
 0x28f   : > { %v644_v53 = vmul.f32 %v639_v42, %v636_v39  ;;  %v645_v54 = vmul.f32 %v639_v42, %v637_v40  ;;  %v646_v55 = vmul.f32 %v639_v42, %v638_v41 }
 0x290   : > { %v654_v59 = vmul.f32 %v647_v37, %v640_v46  ;;  %v655_v60 = vmul.f32 %v648_v38, %v641_v47  ;;  %v656_v61 = vmul.f32 %v649_v43, %v642_v48  ;;  %v657_v62 = vmul.f32 %v650_v44, %v643_v49 }
 0x291   : > { %v658_v2 = vmul.f32 %v651_v45, %v644_v53  ;;  %v659_v3 = vmul.f32 %v652_v50, %v645_v54  ;;  %v660_v4 = vmul.f32 %v653_v51, %v646_v55 }
 0x292   : > { %v668_v5 = vadd.f32 %v661_v52, %v654_v59  ;;  %v669_v6 = vadd.f32 %v662_v56, %v655_v60  ;;  %v670_v7 = vadd.f32 %v663_v57, %v656_v61  ;;  %v671_v8 = vadd.f32 %v664_v58, %v657_v62 }
 0x293   : > { %v672_v9 = vadd.f32 %v665_v63, %v658_v2  ;;  %v673_v10 = vadd.f32 %v666_v0, %v659_v3  ;;  %v674_v11 = vadd.f32 %v667_v1, %v660_v4 }
 0x294   : > { %675 = vst [vmem:[%s224_s21] sm:$0xff] %v668_v5  ;;  %676 = vst [vmem:[%s224_s21 + $0x8] sm:$0xff] %v669_v6 }
 0x295   : > { %677 = vst [vmem:[%s224_s21 + $0x10] sm:$0xff] %v670_v7  ;;  %678 = vst [vmem:[%s224_s21 + $0x18] sm:$0xff] %v671_v8 }
 0x296   : > { %679 = vst [vmem:[%s224_s21 + $0x20] sm:$0xff] %v672_v9  ;;  %680 = vst [vmem:[%s224_s21 + $0x28] sm:$0xff] %v673_v10 }
 0x297   : > { %681 = vst.msk [vmem:[%s224_s21 + $0x30] sm:$0xff] %vm581_vm3, %v674_v11 }
 0x298 PF: > { %s15_s18 = sadd.s32 1, %s804_s18  }
 0x299   : > { %p12_p4 = scmp.ge.s32.totalorder %s15_s18, 4  }
 0x29b   :  { %14 = sbr.rel (!%p12_p4) target bundleno = 1 (0x1), region = 70 }

</bundles_post_ra>
